<compile_context>
chip_gen: v7x
topology: tpu7x:2x2x1
jax: 0.10.0
libtpu: 0.0.40
codegen_flags: <defaults>
</compile_context>

<pallas_src>
import functools

import jax
import jax.numpy as jnp
from jax.experimental import pallas as pl
from jax.experimental.pallas import tpu as pltpu


# --------------------------------------------------------------------------
# Kernel
# --------------------------------------------------------------------------
def _rdpa_kernel(x_ref, xr_ref, y_ref, py_ref, out_ref,
                 s1_ref, s2_ref, d_ref, y1_ref, y2_ref, r_ref, *,
                 lam, beta, inv_dist, inv_rate, inv_b, spatial, sy, ns_y):
    """One (batch-tile, spatial-tile) step of the RateDistorsionPenaltyA loss.

    x_ref / xr_ref : (bt, C, ts)   lane-dense spatial tile of the images
    y_ref / py_ref : (bt, K, tsy)  lane-dense tile of the latent (only the
                                   first `ns_y` spatial steps consume it)
    out_ref        : (1, 8, 128)   per-batch-tile partial result block
                                   [0,0,0] = loss partial, [0,1,0] = max-energy
    s1/s2/d_ref    : (bt, 1, ts)   lane-parallel running partial sums (VPU adds)
    y1/y2_ref      : (bt, K, tsy)  lane-parallel latent partial sums
    r_ref          : (bt, 1, tsy)  lane-parallel sum of log2(p_y)
    """
    si = pl.program_id(1)
    ns = pl.num_programs(1)

    @pl.when(si == 0)
    def _init():
        s1_ref[...] = jnp.zeros_like(s1_ref)
        s2_ref[...] = jnp.zeros_like(s2_ref)
        d_ref[...] = jnp.zeros_like(d_ref)
        y1_ref[...] = jnp.zeros_like(y1_ref)
        y2_ref[...] = jnp.zeros_like(y2_ref)
        r_ref[...] = jnp.zeros_like(r_ref)

    # ---- image tile: lane-parallel partial sums (pure VPU adds) -----------
    x = x_ref[...].astype(jnp.float32)       # (bt, C, ts)
    xr = xr_ref[...].astype(jnp.float32)
    c = x.shape[1]

    # Channel mean with keepdims -> stays in the same (sublane, lane) layout
    # family as x; no relayout.
    cm = jnp.sum(x, axis=1, keepdims=True) * (1.0 / c)     # (bt, 1, ts)
    s1_ref[...] += cm
    s2_ref[...] += cm * cm

    diff = xr - x
    d_ref[...] += jnp.sum(diff * diff, axis=1, keepdims=True)   # (bt, 1, ts)

    # ---- latent tile: only the first ns_y spatial steps carry new data ----
    @pl.when(si < ns_y)
    def _latent():
        yv = y_ref[...].astype(jnp.float32)      # (bt, K, tsy)
        pv = py_ref[...].astype(jnp.float32)
        y1_ref[...] += yv
        y2_ref[...] += yv * yv
        # accumulate +log2; negate once (scalar) in the finalize step
        r_ref[...] += jnp.sum(jnp.log2(pv), axis=1, keepdims=True)

    # ---- finalize: single cross-lane reduce + tiny per-channel math -------
    @pl.when(si == ns - 1)
    def _finalize():
        # Unbiased variance of the channel-mean image (single pass).
        # (Mathematically cancels out of the A normalization; kept for
        #  fidelity with the reference module.)
        s1 = jnp.sum(s1_ref[...], axis=-1, keepdims=True)       # (bt,1,1)
        s2 = jnp.sum(s2_ref[...], axis=-1, keepdims=True)
        x_var = (jnp.maximum(s2 - s1 * s1 * (1.0 / spatial), 0.0)
                 * (1.0 / (spatial - 1.0)) + 1e-10)

        # Per-channel unbiased variance of y (single pass).
        ys1 = jnp.sum(y1_ref[...], axis=-1, keepdims=True)      # (bt,K,1)
        ys2 = jnp.sum(y2_ref[...], axis=-1, keepdims=True)
        y_var = (jnp.maximum(ys2 - ys1 * ys1 * (1.0 / sy), 0.0)
                 * (1.0 / (sy - 1.0)))

        # Energy distribution, its max and entropy (per batch element).
        a = y_var / x_var                                        # (bt,K,1)
        a = a / jnp.sum(a, axis=1, keepdims=True)
        max_e = jnp.max(a, axis=1, keepdims=True)                # (bt,1,1)
        p_a = jnp.sum(-a * jnp.log2(a + 1e-10), axis=1, keepdims=True)

        rate = -jnp.sum(r_ref[...])          # single scalar negation
        dist = jnp.sum(d_ref[...])

        loss_part = (lam * inv_dist * dist
                     + inv_rate * rate
                     + beta * inv_b * jnp.sum(p_a))
        me_part = inv_b * jnp.sum(max_e)

        # Lane-dense output block: sublane 0 = loss partial, sublane 1 = max-E.
        sub = jax.lax.broadcasted_iota(jnp.int32, out_ref.shape, 1)
        out_ref[...] = jnp.where(sub == 0, loss_part,
                                 jnp.where(sub == 1, me_part, 0.0))


# --------------------------------------------------------------------------
# Tiling / VMEM accounting helpers
# --------------------------------------------------------------------------
def _divisors_desc(n):
    return [d for d in range(n, 0, -1) if n % d == 0]


def _pad_to(n, m):
    return ((n + m - 1) // m) * m


def _sublane_pad(n, itemsize):
    return _pad_to(n, max(1, 32 // itemsize))       # 8 f32 / 16 bf16 / 32 i8


def _latent_tile(sy, ns):
    """Smallest lane-aligned divisor of Sy with Sy//tile <= ns; else Sy."""
    cands = [d for d in _divisors_desc(sy) if d % 128 == 0 and sy // d <= ns]
    return cands[-1] if cands else sy


def _step_bytes(bt, ts, tsy, C, K, isz_img, isz_lat):
    """Honest per-step VMEM estimate: padded sublanes + f32 temporaries."""
    tsp, tsyp = _pad_to(ts, 128), _pad_to(tsy, 128)
    cp_in, kp_in = _sublane_pad(C, isz_img), _sublane_pad(K, isz_lat)
    cp32, kp32 = _sublane_pad(C, 4), _sublane_pad(K, 4)
    img_in = 2 * 2 * bt * cp_in * tsp * isz_img       # x, x_r double-buffered
    lat_in = 2 * 2 * bt * kp_in * tsyp * isz_lat      # y, p_y double-buffered
    scr = bt * (3 * 8 * tsp + 2 * kp32 * tsyp + 8 * tsyp) * 4   # accumulators
    tmp = bt * (3 * cp32 * tsp + 3 * kp32 * tsyp) * 4           # f32 upcasts
    out_buf = 2 * 8 * 128 * 4
    return img_in + lat_in + scr + tmp + out_buf


# --------------------------------------------------------------------------
# Wrapper
# --------------------------------------------------------------------------
def rate_distorsion_penalty_a(x, y, x_r, p_y,
                              distorsion_lambda=0.01, penalty_beta=0.001):
    """Pallas implementation of RateDistorsionPenaltyA.forward.

    Returns (loss, mean_max_energy) as float32 scalars.
    """
    B, C, H, W = x.shape
    Bk, K, Hy, Wy = y.shape
    assert B == Bk and x_r.shape == x.shape and p_y.shape == y.shape

    S, Sy = H * W, Hy * Wy
    isz_img = x.dtype.itemsize
    isz_lat = y.dtype.itemsize

    # Wrapper-side reshape to lane-dense 3D slabs (free for contiguous NCHW).
    x3 = x.reshape(B, C, S)
    xr3 = x_r.reshape(B, C, S)
    y3 = y.reshape(B, K, Sy)
    py3 = p_y.reshape(B, K, Sy)

    # ---- tile selection ----------------------------------------------------
    try:
        vmem_cap = int(pltpu.get_tpu_info().vmem_capacity_bytes)
    except Exception:
        vmem_cap = 64 * 1024 * 1024     # conservative (v7x per-core VMEM)
    budget = int(0.6 * vmem_cap)

    lane_divs = [d for d in _divisors_desc(S) if d % 128 == 0]
    if lane_divs:
        # Cap the image tile at 4096 lanes: streaming saturates HBM well
        # before "largest block that fits", and this leaves VMEM slack.
        pref = next((d for d in lane_divs if d <= 4096), lane_divs[-1])
        ts_cands = [d for d in lane_divs if d <= pref]      # descending
    else:
        # TODO(synk): pad H*W wrapper-side to a multiple of 128 for odd sizes.
        ts_cands = [S]

    # Keep >= 2 batch tiles so the "parallel" axis can shard across the two
    # TensorCores on v7x (harmless on single-TC v5e/v6e).
    bt_cap = max(1, B // 2) if B >= 2 else 1

    def _fits(bt_, ts_, tsy_):
        return _step_bytes(bt_, ts_, tsy_, C, K, isz_img, isz_lat) <= budget

    bt, ts, tsy, found = 1, ts_cands[-1], Sy, False
    for ts_c in ts_cands:
        tsy_c = _latent_tile(Sy, S // ts_c)
        for bt_c in _divisors_desc(B):
            if bt_c > bt_cap:
                continue
            if _fits(bt_c, ts_c, tsy_c):
                bt, ts, tsy, found = bt_c, ts_c, tsy_c, True
                break
        if found:
            break
    if not found:
        ts = ts_cands[-1]
        tsy = _latent_tile(Sy, S // ts)
        bt = 1

    nb, ns, ns_y = B // bt, S // ts, Sy // tsy

    est = _step_bytes(bt, ts, tsy, C, K, isz_img, isz_lat)
    vmem_limit = int(min(max(est + (8 << 20), 32 << 20), 0.9 * vmem_cap))

    # Advisory cost estimate for XLA's scheduler.
    cost = pl.CostEstimate(
        flops=int(6 * B * C * S + 6 * B * K * Sy),
        transcendentals=int(B * K * (Sy + 1)),
        bytes_accessed=int(B * C * S * 2 * isz_img
                           + B * K * Sy * 2 * isz_lat
                           + nb * 8 * 128 * 4),
    )

    kernel = functools.partial(
        _rdpa_kernel,
        lam=float(distorsion_lambda),
        beta=float(penalty_beta),
        inv_dist=1.0 / float(B * C * S),
        inv_rate=1.0 / float(B * K * Sy),
        inv_b=1.0 / float(B),
        spatial=float(S),
        sy=float(Sy),
        ns_y=int(ns_y),
    )

    out = pl.pallas_call(
        kernel,
        out_shape=jax.ShapeDtypeStruct((nb, 8, 128), jnp.float32),
        grid=(nb, ns),
        in_specs=[
            pl.BlockSpec((bt, C, ts), lambda bi, si: (bi, 0, si)),     # x
            pl.BlockSpec((bt, C, ts), lambda bi, si: (bi, 0, si)),     # x_r
            pl.BlockSpec((bt, K, tsy),
                         lambda bi, si: (bi, 0, jnp.minimum(si, ns_y - 1))),  # y
            pl.BlockSpec((bt, K, tsy),
                         lambda bi, si: (bi, 0, jnp.minimum(si, ns_y - 1))),  # p_y
        ],
        out_specs=pl.BlockSpec((1, 8, 128), lambda bi, si: (bi, 0, 0)),
        scratch_shapes=[
            pltpu.VMEM((bt, 1, ts), jnp.float32),     # sum of channel-mean
            pltpu.VMEM((bt, 1, ts), jnp.float32),     # sum of sq. channel-mean
            pltpu.VMEM((bt, 1, ts), jnp.float32),     # sum of squared error
            pltpu.VMEM((bt, K, tsy), jnp.float32),    # sum of y
            pltpu.VMEM((bt, K, tsy), jnp.float32),    # sum of y^2
            pltpu.VMEM((bt, 1, tsy), jnp.float32),    # sum of log2(p_y)
        ],
        compiler_params=pltpu.CompilerParams(
            dimension_semantics=("parallel", "arbitrary"),
            vmem_limit_bytes=vmem_limit),
        cost_estimate=cost,
    )(x3, xr3, y3, py3)

    # Sum per-batch-tile partials (tiny; merges the two-TC partials on v7x).
    loss = jnp.sum(out[:, 0, 0])
    mean_max_energy = jnp.sum(out[:, 1, 0])
    return loss, mean_max_energy


# --------------------------------------------------------------------------
# Pure-JAX reference mirroring the PyTorch forward exactly.
# --------------------------------------------------------------------------
def _reference(x, y, x_r, p_y, lam=0.01, beta=0.001):
    x_mean = jnp.mean(x, axis=1)
    x_var = jnp.var(x_mean, axis=(1, 2), ddof=1)[:, None] + 1e-10
    A = jnp.var(y, axis=(2, 3), ddof=1) / x_var
    A = A / jnp.sum(A, axis=1, keepdims=True)
    max_energy = jnp.max(A, axis=1)
    P_A = jnp.sum(-A * jnp.log2(A + 1e-10), axis=1)
    dist = jnp.mean((x_r - x) ** 2)
    rate = jnp.mean(-jnp.log2(p_y))
    return (lam * dist + rate + beta * jnp.mean(P_A), jnp.mean(max_energy))


if __name__ == "__main__":
    key = jax.random.PRNGKey(0)
    k1, k2, k3, k4 = jax.random.split(key, 4)

    B, C, H, W = 2, 4, 16, 16       # image  (NCHW)
    K, Hy, Wy = 8, 8, 8             # latent (NCHW)

    x = jax.random.normal(k1, (B, C, H, W), dtype=jnp.float32)
    x_r = x + 0.1 * jax.random.normal(k2, (B, C, H, W), dtype=jnp.float32)
    y = jax.random.normal(k3, (B, K, Hy, Wy), dtype=jnp.float32)
    # probabilities must be in (0, 1] for -log2
    p_y = jax.random.uniform(k4, (B, K, Hy, Wy), dtype=jnp.float32,
                             minval=0.05, maxval=1.0)

    loss, mean_max_energy = rate_distorsion_penalty_a(
        x, y, x_r, p_y, distorsion_lambda=0.01, penalty_beta=0.001)
    loss = jax.block_until_ready(loss)
    mean_max_energy = jax.block_until_ready(mean_max_energy)

    ref_loss, ref_me = _reference(x, y, x_r, p_y, 0.01, 0.001)
    assert jnp.allclose(loss, ref_loss, rtol=2e-3, atol=1e-5), (loss, ref_loss)
    assert jnp.allclose(mean_max_energy, ref_me, rtol=2e-3, atol=1e-5), (
        mean_max_energy, ref_me)

    print("KERNEL_OK")
</pallas_src>

<mosaic_0001>
module attributes {stable_mosaic.version = 11 : i64} {
  func.func @_rdpa_kernel(%arg0: i32, %arg1: i32, %arg2: memref<1x4x256xf32, #tpu.memory_space<vmem>>, %arg3: memref<1x4x256xf32, #tpu.memory_space<vmem>>, %arg4: memref<1x8x64xf32, #tpu.memory_space<vmem>>, %arg5: memref<1x8x64xf32, #tpu.memory_space<vmem>>, %arg6: memref<1x8x128xf32, #tpu.memory_space<vmem>>, %arg7: memref<1x1x256xf32, #tpu.memory_space<vmem>>, %arg8: memref<1x1x256xf32, #tpu.memory_space<vmem>>, %arg9: memref<1x1x256xf32, #tpu.memory_space<vmem>>, %arg10: memref<1x8x64xf32, #tpu.memory_space<vmem>>, %arg11: memref<1x8x64xf32, #tpu.memory_space<vmem>>, %arg12: memref<1x1x64xf32, #tpu.memory_space<vmem>>) attributes {dimension_semantics = [#tpu.dimension_semantics<parallel>, #tpu.dimension_semantics<arbitrary>], iteration_bounds = array<i64: 2, 1>, scalar_prefetch = 0 : i64, scratch_operands = 6 : i64, tpu.core_type = #tpu.core_type<tc>, window_params = [{transform_indices = @transform_0, window_bounds = array<i64: 1, 4, 256>}, {transform_indices = @transform_1, window_bounds = array<i64: 1, 4, 256>}, {transform_indices = @transform_2, window_bounds = array<i64: 1, 8, 64>}, {transform_indices = @transform_3, window_bounds = array<i64: 1, 8, 64>}, {transform_indices = @transform_4, window_bounds = array<i64: 1, 8, 128>}]} {
    %c0_i32 = arith.constant 0 : i32
    %0 = arith.cmpi eq, %arg1, %c0_i32 : i32
    %1 = arith.extui %0 : i1 to i32
    %c0_i32_0 = arith.constant 0 : i32
    %2 = arith.cmpi ne, %1, %c0_i32_0 : i32
    scf.if %2 {
      %cst_29 = arith.constant 0.000000e+00 : f32
      %29 = vector.broadcast %cst_29 : f32 to vector<1x1x256xf32>
      %c0_30 = arith.constant 0 : index
      %c0_31 = arith.constant 0 : index
      %c0_32 = arith.constant 0 : index
      %30 = vector.load %arg7[%c0_30, %c0_31, %c0_32] : memref<1x1x256xf32, #tpu.memory_space<vmem>>, vector<1x1x256xf32>
      tpu.vector_store %arg7[%c0_30, %c0_31, %c0_32], %29 {strides = array<i32>} : memref<1x1x256xf32, #tpu.memory_space<vmem>>, vector<1x1x256xf32>,
      %cst_33 = arith.constant 0.000000e+00 : f32
      %31 = vector.broadcast %cst_33 : f32 to vector<1x1x256xf32>
      %c0_34 = arith.constant 0 : index
      %c0_35 = arith.constant 0 : index
      %c0_36 = arith.constant 0 : index
      %32 = vector.load %arg8[%c0_34, %c0_35, %c0_36] : memref<1x1x256xf32, #tpu.memory_space<vmem>>, vector<1x1x256xf32>
      tpu.vector_store %arg8[%c0_34, %c0_35, %c0_36], %31 {strides = array<i32>} : memref<1x1x256xf32, #tpu.memory_space<vmem>>, vector<1x1x256xf32>,
      %cst_37 = arith.constant 0.000000e+00 : f32
      %33 = vector.broadcast %cst_37 : f32 to vector<1x1x256xf32>
      %c0_38 = arith.constant 0 : index
      %c0_39 = arith.constant 0 : index
      %c0_40 = arith.constant 0 : index
      %34 = vector.load %arg9[%c0_38, %c0_39, %c0_40] : memref<1x1x256xf32, #tpu.memory_space<vmem>>, vector<1x1x256xf32>
      tpu.vector_store %arg9[%c0_38, %c0_39, %c0_40], %33 {strides = array<i32>} : memref<1x1x256xf32, #tpu.memory_space<vmem>>, vector<1x1x256xf32>,
      %cst_41 = arith.constant 0.000000e+00 : f32
      %35 = vector.broadcast %cst_41 : f32 to vector<1x8x64xf32>
      %c0_42 = arith.constant 0 : index
      %c0_43 = arith.constant 0 : index
      %c0_44 = arith.constant 0 : index
      %36 = vector.load %arg10[%c0_42, %c0_43, %c0_44] : memref<1x8x64xf32, #tpu.memory_space<vmem>>, vector<1x8x64xf32>
      tpu.vector_store %arg10[%c0_42, %c0_43, %c0_44], %35 {strides = array<i32>} : memref<1x8x64xf32, #tpu.memory_space<vmem>>, vector<1x8x64xf32>,
      %cst_45 = arith.constant 0.000000e+00 : f32
      %37 = vector.broadcast %cst_45 : f32 to vector<1x8x64xf32>
      %c0_46 = arith.constant 0 : index
      %c0_47 = arith.constant 0 : index
      %c0_48 = arith.constant 0 : index
      %38 = vector.load %arg11[%c0_46, %c0_47, %c0_48] : memref<1x8x64xf32, #tpu.memory_space<vmem>>, vector<1x8x64xf32>
      tpu.vector_store %arg11[%c0_46, %c0_47, %c0_48], %37 {strides = array<i32>} : memref<1x8x64xf32, #tpu.memory_space<vmem>>, vector<1x8x64xf32>,
      %cst_49 = arith.constant 0.000000e+00 : f32
      %39 = vector.broadcast %cst_49 : f32 to vector<1x1x64xf32>
      %c0_50 = arith.constant 0 : index
      %c0_51 = arith.constant 0 : index
      %c0_52 = arith.constant 0 : index
      %40 = vector.load %arg12[%c0_50, %c0_51, %c0_52] : memref<1x1x64xf32, #tpu.memory_space<vmem>>, vector<1x1x64xf32>
      tpu.vector_store %arg12[%c0_50, %c0_51, %c0_52], %39 {strides = array<i32>} : memref<1x1x64xf32, #tpu.memory_space<vmem>>, vector<1x1x64xf32>,
    } else {
    }
    %c0 = arith.constant 0 : index
    %c0_1 = arith.constant 0 : index
    %c0_2 = arith.constant 0 : index
    %3 = vector.load %arg2[%c0, %c0_1, %c0_2] : memref<1x4x256xf32, #tpu.memory_space<vmem>>, vector<1x4x256xf32>
    %c0_3 = arith.constant 0 : index
    %c0_4 = arith.constant 0 : index
    %c0_5 = arith.constant 0 : index
    %4 = vector.load %arg3[%c0_3, %c0_4, %c0_5] : memref<1x4x256xf32, #tpu.memory_space<vmem>>, vector<1x4x256xf32>
    %cst = arith.constant dense<0.000000e+00> : vector<1x256xf32>
    %5 = vector.multi_reduction <add>, %3, %cst [1] : vector<1x4x256xf32> to vector<1x256xf32>
    %6 = vector.shape_cast %5 : vector<1x256xf32> to vector<1x1x256xf32>
    %cst_6 = arith.constant 2.500000e-01 : f32
    %7 = vector.broadcast %cst_6 : f32 to vector<1x1x256xf32>
    %8 = arith.mulf %6, %7 : vector<1x1x256xf32>
    %c0_7 = arith.constant 0 : index
    %c0_8 = arith.constant 0 : index
    %c0_9 = arith.constant 0 : index
    %9 = vector.load %arg7[%c0_7, %c0_8, %c0_9] : memref<1x1x256xf32, #tpu.memory_space<vmem>>, vector<1x1x256xf32>
    %10 = arith.addf %9, %8 : vector<1x1x256xf32>
    %c0_10 = arith.constant 0 : index
    %c0_11 = arith.constant 0 : index
    %c0_12 = arith.constant 0 : index
    %11 = vector.load %arg7[%c0_10, %c0_11, %c0_12] : memref<1x1x256xf32, #tpu.memory_space<vmem>>, vector<1x1x256xf32>
    tpu.vector_store %arg7[%c0_10, %c0_11, %c0_12], %10 {strides = array<i32>} : memref<1x1x256xf32, #tpu.memory_space<vmem>>, vector<1x1x256xf32>,
    %c0_13 = arith.constant 0 : index
    %c0_14 = arith.constant 0 : index
    %c0_15 = arith.constant 0 : index
    %12 = vector.load %arg8[%c0_13, %c0_14, %c0_15] : memref<1x1x256xf32, #tpu.memory_space<vmem>>, vector<1x1x256xf32>
    %13 = arith.mulf %8, %8 : vector<1x1x256xf32>
    %14 = arith.addf %12, %13 : vector<1x1x256xf32>
    %c0_16 = arith.constant 0 : index
    %c0_17 = arith.constant 0 : index
    %c0_18 = arith.constant 0 : index
    %15 = vector.load %arg8[%c0_16, %c0_17, %c0_18] : memref<1x1x256xf32, #tpu.memory_space<vmem>>, vector<1x1x256xf32>
    tpu.vector_store %arg8[%c0_16, %c0_17, %c0_18], %14 {strides = array<i32>} : memref<1x1x256xf32, #tpu.memory_space<vmem>>, vector<1x1x256xf32>,
    %16 = arith.subf %4, %3 : vector<1x4x256xf32>
    %c0_19 = arith.constant 0 : index
    %c0_20 = arith.constant 0 : index
    %c0_21 = arith.constant 0 : index
    %17 = vector.load %arg9[%c0_19, %c0_20, %c0_21] : memref<1x1x256xf32, #tpu.memory_space<vmem>>, vector<1x1x256xf32>
    %18 = arith.mulf %16, %16 : vector<1x4x256xf32>
    %cst_22 = arith.constant dense<0.000000e+00> : vector<1x256xf32>
    %19 = vector.multi_reduction <add>, %18, %cst_22 [1] : vector<1x4x256xf32> to vector<1x256xf32>
    %20 = vector.shape_cast %19 : vector<1x256xf32> to vector<1x1x256xf32>
    %21 = arith.addf %17, %20 : vector<1x1x256xf32>
    %c0_23 = arith.constant 0 : index
    %c0_24 = arith.constant 0 : index
    %c0_25 = arith.constant 0 : index
    %22 = vector.load %arg9[%c0_23, %c0_24, %c0_25] : memref<1x1x256xf32, #tpu.memory_space<vmem>>, vector<1x1x256xf32>
    tpu.vector_store %arg9[%c0_23, %c0_24, %c0_25], %21 {strides = array<i32>} : memref<1x1x256xf32, #tpu.memory_space<vmem>>, vector<1x1x256xf32>,
    %c1_i32 = arith.constant 1 : i32
    %23 = arith.cmpi slt, %arg1, %c1_i32 : i32
    %24 = arith.extui %23 : i1 to i32
    %c0_i32_26 = arith.constant 0 : i32
    %25 = arith.cmpi ne, %24, %c0_i32_26 : i32
    scf.if %25 {
      %c0_29 = arith.constant 0 : index
      %c0_30 = arith.constant 0 : index
      %c0_31 = arith.constant 0 : index
      %29 = vector.load %arg4[%c0_29, %c0_30, %c0_31] : memref<1x8x64xf32, #tpu.memory_space<vmem>>, vector<1x8x64xf32>
      %c0_32 = arith.constant 0 : index
      %c0_33 = arith.constant 0 : index
      %c0_34 = arith.constant 0 : index
      %30 = vector.load %arg5[%c0_32, %c0_33, %c0_34] : memref<1x8x64xf32, #tpu.memory_space<vmem>>, vector<1x8x64xf32>
      %c0_35 = arith.constant 0 : index
      %c0_36 = arith.constant 0 : index
      %c0_37 = arith.constant 0 : index
      %31 = vector.load %arg10[%c0_35, %c0_36, %c0_37] : memref<1x8x64xf32, #tpu.memory_space<vmem>>, vector<1x8x64xf32>
      %32 = arith.addf %31, %29 : vector<1x8x64xf32>
      %c0_38 = arith.constant 0 : index
      %c0_39 = arith.constant 0 : index
      %c0_40 = arith.constant 0 : index
      %33 = vector.load %arg10[%c0_38, %c0_39, %c0_40] : memref<1x8x64xf32, #tpu.memory_space<vmem>>, vector<1x8x64xf32>
      tpu.vector_store %arg10[%c0_38, %c0_39, %c0_40], %32 {strides = array<i32>} : memref<1x8x64xf32, #tpu.memory_space<vmem>>, vector<1x8x64xf32>,
      %c0_41 = arith.constant 0 : index
      %c0_42 = arith.constant 0 : index
      %c0_43 = arith.constant 0 : index
      %34 = vector.load %arg11[%c0_41, %c0_42, %c0_43] : memref<1x8x64xf32, #tpu.memory_space<vmem>>, vector<1x8x64xf32>
      %35 = arith.mulf %29, %29 : vector<1x8x64xf32>
      %36 = arith.addf %34, %35 : vector<1x8x64xf32>
      %c0_44 = arith.constant 0 : index
      %c0_45 = arith.constant 0 : index
      %c0_46 = arith.constant 0 : index
      %37 = vector.load %arg11[%c0_44, %c0_45, %c0_46] : memref<1x8x64xf32, #tpu.memory_space<vmem>>, vector<1x8x64xf32>
      tpu.vector_store %arg11[%c0_44, %c0_45, %c0_46], %36 {strides = array<i32>} : memref<1x8x64xf32, #tpu.memory_space<vmem>>, vector<1x8x64xf32>,
      %c0_47 = arith.constant 0 : index
      %c0_48 = arith.constant 0 : index
      %c0_49 = arith.constant 0 : index
      %38 = vector.load %arg12[%c0_47, %c0_48, %c0_49] : memref<1x1x64xf32, #tpu.memory_space<vmem>>, vector<1x1x64xf32>
      %39 = math.log %30 : vector<1x8x64xf32>
      %cst_50 = arith.constant 2.000000e+00 : f32
      %40 = math.log %cst_50 : f32
      %41 = vector.broadcast %40 : f32 to vector<1x8x64xf32>
      %42 = arith.divf %39, %41 : vector<1x8x64xf32>
      %cst_51 = arith.constant dense<0.000000e+00> : vector<1x64xf32>
      %43 = vector.multi_reduction <add>, %42, %cst_51 [1] : vector<1x8x64xf32> to vector<1x64xf32>
      %44 = vector.shape_cast %43 : vector<1x64xf32> to vector<1x1x64xf32>
      %45 = arith.addf %38, %44 : vector<1x1x64xf32>
      %c0_52 = arith.constant 0 : index
      %c0_53 = arith.constant 0 : index
      %c0_54 = arith.constant 0 : index
      %46 = vector.load %arg12[%c0_52, %c0_53, %c0_54] : memref<1x1x64xf32, #tpu.memory_space<vmem>>, vector<1x1x64xf32>
      tpu.vector_store %arg12[%c0_52, %c0_53, %c0_54], %45 {strides = array<i32>} : memref<1x1x64xf32, #tpu.memory_space<vmem>>, vector<1x1x64xf32>,
    } else {
    }
    %c0_i32_27 = arith.constant 0 : i32
    %26 = arith.cmpi eq, %arg1, %c0_i32_27 : i32
    %27 = arith.extui %26 : i1 to i32
    %c0_i32_28 = arith.constant 0 : i32
    %28 = arith.cmpi ne, %27, %c0_i32_28 : i32
    scf.if %28 {
      %c0_29 = arith.constant 0 : index
      %c0_30 = arith.constant 0 : index
      %c0_31 = arith.constant 0 : index
      %29 = vector.load %arg7[%c0_29, %c0_30, %c0_31] : memref<1x1x256xf32, #tpu.memory_space<vmem>>, vector<1x1x256xf32>
      %cst_32 = arith.constant dense<0.000000e+00> : vector<1x1xf32>
      %30 = vector.multi_reduction <add>, %29, %cst_32 [2] : vector<1x1x256xf32> to vector<1x1xf32>
      %31 = vector.shape_cast %30 : vector<1x1xf32> to vector<1x1x1xf32>
      %c0_33 = arith.constant 0 : index
      %c0_34 = arith.constant 0 : index
      %c0_35 = arith.constant 0 : index
      %32 = vector.load %arg8[%c0_33, %c0_34, %c0_35] : memref<1x1x256xf32, #tpu.memory_space<vmem>>, vector<1x1x256xf32>
      %cst_36 = arith.constant dense<0.000000e+00> : vector<1x1xf32>
      %33 = vector.multi_reduction <add>, %32, %cst_36 [2] : vector<1x1x256xf32> to vector<1x1xf32>
      %34 = vector.shape_cast %33 : vector<1x1xf32> to vector<1x1x1xf32>
      %35 = arith.mulf %31, %31 : vector<1x1x1xf32>
      %cst_37 = arith.constant 3.906250e-03 : f32
      %36 = vector.broadcast %cst_37 : f32 to vector<1x1x1xf32>
      %37 = arith.mulf %35, %36 : vector<1x1x1xf32>
      %38 = arith.subf %34, %37 : vector<1x1x1xf32>
      %cst_38 = arith.constant 0.000000e+00 : f32
      %39 = vector.broadcast %cst_38 : f32 to vector<1x1x1xf32>
      %40 = arith.maximumf %38, %39 : vector<1x1x1xf32>
      %cst_39 = arith.constant 0.00392156886 : f32
      %41 = vector.broadcast %cst_39 : f32 to vector<1x1x1xf32>
      %42 = arith.mulf %40, %41 : vector<1x1x1xf32>
      %cst_40 = arith.constant 1.000000e-10 : f32
      %43 = vector.broadcast %cst_40 : f32 to vector<1x1x1xf32>
      %44 = arith.addf %42, %43 : vector<1x1x1xf32>
      %c0_41 = arith.constant 0 : index
      %c0_42 = arith.constant 0 : index
      %c0_43 = arith.constant 0 : index
      %45 = vector.load %arg10[%c0_41, %c0_42, %c0_43] : memref<1x8x64xf32, #tpu.memory_space<vmem>>, vector<1x8x64xf32>
      %cst_44 = arith.constant dense<0.000000e+00> : vector<1x8xf32>
      %46 = vector.multi_reduction <add>, %45, %cst_44 [2] : vector<1x8x64xf32> to vector<1x8xf32>
      %47 = vector.shape_cast %46 : vector<1x8xf32> to vector<1x8x1xf32>
      %c0_45 = arith.constant 0 : index
      %c0_46 = arith.constant 0 : index
      %c0_47 = arith.constant 0 : index
      %48 = vector.load %arg11[%c0_45, %c0_46, %c0_47] : memref<1x8x64xf32, #tpu.memory_space<vmem>>, vector<1x8x64xf32>
      %cst_48 = arith.constant dense<0.000000e+00> : vector<1x8xf32>
      %49 = vector.multi_reduction <add>, %48, %cst_48 [2] : vector<1x8x64xf32> to vector<1x8xf32>
      %50 = vector.shape_cast %49 : vector<1x8xf32> to vector<1x8x1xf32>
      %51 = arith.mulf %47, %47 : vector<1x8x1xf32>
      %cst_49 = arith.constant 1.562500e-02 : f32
      %52 = vector.broadcast %cst_49 : f32 to vector<1x8x1xf32>
      %53 = arith.mulf %51, %52 : vector<1x8x1xf32>
      %54 = arith.subf %50, %53 : vector<1x8x1xf32>
      %cst_50 = arith.constant 0.000000e+00 : f32
      %55 = vector.broadcast %cst_50 : f32 to vector<1x8x1xf32>
      %56 = arith.maximumf %54, %55 : vector<1x8x1xf32>
      %cst_51 = arith.constant 0.0158730168 : f32
      %57 = vector.broadcast %cst_51 : f32 to vector<1x8x1xf32>
      %58 = arith.mulf %56, %57 : vector<1x8x1xf32>
      %59 = vector.broadcast %44 : vector<1x1x1xf32> to vector<1x8x1xf32>
      %60 = arith.divf %58, %59 : vector<1x8x1xf32>
      %cst_52 = arith.constant dense<0.000000e+00> : vector<1x1xf32>
      %61 = vector.multi_reduction <add>, %60, %cst_52 [1] : vector<1x8x1xf32> to vector<1x1xf32>
      %62 = vector.shape_cast %61 : vector<1x1xf32> to vector<1x1x1xf32>
      %63 = vector.broadcast %62 : vector<1x1x1xf32> to vector<1x8x1xf32>
      %64 = arith.divf %60, %63 : vector<1x8x1xf32>
      %cst_53 = arith.constant dense<0xFF800000> : vector<1x1xf32>
      %65 = vector.multi_reduction <maximumf>, %64, %cst_53 [1] : vector<1x8x1xf32> to vector<1x1xf32>
      %66 = vector.shape_cast %65 : vector<1x1xf32> to vector<1x1x1xf32>
      %cst_54 = arith.constant 0.000000e+00 : f32
      %67 = vector.broadcast %cst_54 : f32 to vector<1x8x1xf32>
      %68 = arith.subf %67, %64 : vector<1x8x1xf32>
      %cst_55 = arith.constant 1.000000e-10 : f32
      %69 = vector.broadcast %cst_55 : f32 to vector<1x8x1xf32>
      %70 = arith.addf %64, %69 : vector<1x8x1xf32>
      %71 = math.log %70 : vector<1x8x1xf32>
      %cst_56 = arith.constant 2.000000e+00 : f32
      %72 = math.log %cst_56 : f32
      %73 = vector.broadcast %72 : f32 to vector<1x8x1xf32>
      %74 = arith.divf %71, %73 : vector<1x8x1xf32>
      %75 = arith.mulf %68, %74 : vector<1x8x1xf32>
      %cst_57 = arith.constant dense<0.000000e+00> : vector<1x1xf32>
      %76 = vector.multi_reduction <add>, %75, %cst_57 [1] : vector<1x8x1xf32> to vector<1x1xf32>
      %77 = vector.shape_cast %76 : vector<1x1xf32> to vector<1x1x1xf32>
      %c0_58 = arith.constant 0 : index
      %c0_59 = arith.constant 0 : index
      %c0_60 = arith.constant 0 : index
      %78 = vector.load %arg12[%c0_58, %c0_59, %c0_60] : memref<1x1x64xf32, #tpu.memory_space<vmem>>, vector<1x1x64xf32>
      %79 = vector.shape_cast %78 : vector<1x1x64xf32> to vector<1x1x1x64xf32>
      %cst_61 = arith.constant dense<0.000000e+00> : vector<1xf32>
      %80 = vector.multi_reduction <add>, %79, %cst_61 [1, 2, 3] : vector<1x1x1x64xf32> to vector<1xf32>
      %81 = vector.shape_cast %80 : vector<1xf32> to vector<1x1x1x1xf32>
      %82 = vector.extract %81[0, 0, 0, 0] : f32 from vector<1x1x1x1xf32>
      %cst_62 = arith.constant 0.000000e+00 : f32
      %83 = arith.subf %cst_62, %82 : f32
      %c0_63 = arith.constant 0 : index
      %c0_64 = arith.constant 0 : index
      %c0_65 = arith.constant 0 : index
      %84 = vector.load %arg9[%c0_63, %c0_64, %c0_65] : memref<1x1x256xf32, #tpu.memory_space<vmem>>, vector<1x1x256xf32>
      %85 = vector.shape_cast %84 : vector<1x1x256xf32> to vector<1x1x1x256xf32>
      %cst_66 = arith.constant dense<0.000000e+00> : vector<1xf32>
      %86 = vector.multi_reduction <add>, %85, %cst_66 [1, 2, 3] : vector<1x1x1x256xf32> to vector<1xf32>
      %87 = vector.shape_cast %86 : vector<1xf32> to vector<1x1x1x1xf32>
      %88 = vector.extract %87[0, 0, 0, 0] : f32 from vector<1x1x1x1xf32>
      %cst_67 = arith.constant 4.88281239E-6 : f32
      %89 = arith.mulf %cst_67, %88 : f32
      %cst_68 = arith.constant 9.765625E-4 : f32
      %90 = arith.mulf %cst_68, %83 : f32
      %91 = arith.addf %89, %90 : f32
      %92 = vector.shape_cast %77 : vector<1x1x1xf32> to vector<1x1x1x1xf32>
      %cst_69 = arith.constant dense<0.000000e+00> : vector<1xf32>
      %93 = vector.multi_reduction <add>, %92, %cst_69 [1, 2, 3] : vector<1x1x1x1xf32> to vector<1xf32>
      %94 = vector.shape_cast %93 : vector<1xf32> to vector<1x1x1x1xf32>
      %95 = vector.extract %94[0, 0, 0, 0] : f32 from vector<1x1x1x1xf32>
      %cst_70 = arith.constant 5.000000e-04 : f32
      %96 = arith.mulf %cst_70, %95 : f32
      %97 = arith.addf %91, %96 : f32
      %98 = vector.shape_cast %66 : vector<1x1x1xf32> to vector<1x1x1x1xf32>
      %cst_71 = arith.constant dense<0.000000e+00> : vector<1xf32>
      %99 = vector.multi_reduction <add>, %98, %cst_71 [1, 2, 3] : vector<1x1x1x1xf32> to vector<1xf32>
      %100 = vector.shape_cast %99 : vector<1xf32> to vector<1x1x1x1xf32>
      %101 = vector.extract %100[0, 0, 0, 0] : f32 from vector<1x1x1x1xf32>
      %cst_72 = arith.constant 5.000000e-01 : f32
      %102 = arith.mulf %cst_72, %101 : f32
      %103 = tpu.iota {dimensions = array<i32: 1>} : vector<1x8x128xi32>
      %c0_i32_73 = arith.constant 0 : i32
      %104 = vector.broadcast %c0_i32_73 : i32 to vector<1x8x128xi32>
      %105 = arith.cmpi eq, %103, %104 : vector<1x8x128xi32>
      %c1_i32_74 = arith.constant 1 : i32
      %106 = vector.broadcast %c1_i32_74 : i32 to vector<1x8x128xi32>
      %107 = arith.cmpi eq, %103, %106 : vector<1x8x128xi32>
      %cst_75 = arith.constant 0.000000e+00 : f32
      %108 = vector.broadcast %102 : f32 to vector<1x8x128xf32>
      %109 = vector.broadcast %cst_75 : f32 to vector<1x8x128xf32>
      %110 = arith.select %107, %108, %109 : vector<1x8x128xi1>, vector<1x8x128xf32>
      %111 = vector.broadcast %97 : f32 to vector<1x8x128xf32>
      %112 = arith.select %105, %111, %110 : vector<1x8x128xi1>, vector<1x8x128xf32>
      %c0_76 = arith.constant 0 : index
      %c0_77 = arith.constant 0 : index
      %c0_78 = arith.constant 0 : index
      %113 = vector.load %arg6[%c0_76, %c0_77, %c0_78] : memref<1x8x128xf32, #tpu.memory_space<vmem>>, vector<1x8x128xf32>
      tpu.vector_store %arg6[%c0_76, %c0_77, %c0_78], %112 {strides = array<i32>} : memref<1x8x128xf32, #tpu.memory_space<vmem>>, vector<1x8x128xf32>,
    } else {
    }
    return
  }
  func.func @transform_0(%arg0: i32, %arg1: i32) -> (i32, i32, i32) {
    %c0_i32 = arith.constant 0 : i32
    %c0_i32_0 = arith.constant 0 : i32
    return %arg0, %c0_i32, %arg1 : i32, i32, i32
  }
  func.func @transform_1(%arg0: i32, %arg1: i32) -> (i32, i32, i32) {
    %c0_i32 = arith.constant 0 : i32
    %c0_i32_0 = arith.constant 0 : i32
    return %arg0, %c0_i32, %arg1 : i32, i32, i32
  }
  func.func @transform_2(%arg0: i32, %arg1: i32) -> (i32, i32, i32) {
    %c0_i32 = arith.constant 0 : i32
    %0 = arith.minsi %arg1, %c0_i32 : i32
    %c0_i32_0 = arith.constant 0 : i32
    %c0_i32_1 = arith.constant 0 : i32
    return %arg0, %c0_i32_0, %0 : i32, i32, i32
  }
  func.func @transform_3(%arg0: i32, %arg1: i32) -> (i32, i32, i32) {
    %c0_i32 = arith.constant 0 : i32
    %0 = arith.minsi %arg1, %c0_i32 : i32
    %c0_i32_0 = arith.constant 0 : i32
    %c0_i32_1 = arith.constant 0 : i32
    return %arg0, %c0_i32_0, %0 : i32, i32, i32
  }
  func.func @transform_4(%arg0: i32, %arg1: i32) -> (i32, i32, i32) {
    %c0_i32 = arith.constant 0 : i32
    %c0_i32_0 = arith.constant 0 : i32
    %c0_i32_1 = arith.constant 0 : i32
    return %arg0, %c0_i32, %c0_i32_0 : i32, i32, i32
  }
}

</mosaic_0001>

<bundles_post_ra>
// kernel: tpu_custom_call.1
= control target key start
LH: loop header
LB: loop body
LE: loop exit
PB: predicated region body
PF: predicated region fallthrough
CT: control target
= control target key end

     0   :  { %s1539_s0 = inlined_call_operand.hbm [shape: f32[2,4,256], index: 0, kind: input, shape index: {}]   ;;  %s1540_s1 = inlined_call_operand.hbm [shape: f32[2,4,256], index: 1, kind: input, shape index: {}]   ;;  %s1541_s2 = inlined_call_operand.hbm [shape: f32[2,8,64], index: 2, kind: input, shape index: {}]   ;;  %s1542_s3 = inlined_call_operand.hbm [shape: f32[2,8,64], index: 3, kind: input, shape index: {}]   ;;  %s1543_s4 = inlined_call_operand.hbm [shape: f32[2,8,128], index: 4, kind: output, shape index: {}]  }
   0x1   :  { %1553 = sst [smem:[#allocation26_spill]] %s1540_s1 }
   0x2   :  { %9 = vsyncpa [#allocation9], 0 }
   0x3   :  { %11 = vsyncpa [#allocation9 + $0x1], 0 }
   0x4   :  { %12 = vsyncpa [#allocation12], 0 }
   0x5   :  { %14 = vsyncpa [#allocation12 + $0x1], 0 }
   0x6   :  { %15 = vsyncpa [#allocation15], 0 }
   0x7   :  { %17 = vsyncpa [#allocation15 + $0x1], 0 }
   0x8   :  { %18 = vsyncpa [#allocation10], 0 }
   0x9   :  { %20 = vsyncpa [#allocation10 + $0x1], 0  ;;  %s1201_s15 = smov 0   ;;  %s1203_s16 = smov 0  }
   0xa   :  { %s1205_s17 = smov 0   ;;  %s1207_s18 = smov 0  }
   0xb   :  { %s1209_s19 = smov 0   ;;  %s1211_s20 = smov 0  }
   0xc LB: > { %1554 = sst [smem:[#allocation21_spill]] %s1155_s17  ;;  %s1232_s21 = sadd.s32 4294967295, %s1167_s20   ;;  %s1167_s20 = sphi %s1211_s20, %s26_s20   ;;  %s1163_s19 = sphi %s1209_s19, %s1582_s19   ;;  %s1159_s18 = sphi %s1207_s18, %s1581_s18   ;;  %s1155_s17 = sphi %s1205_s17, %s1580_s17   ;;  %s1151_s16 = sphi %s1203_s16, %s1584_s16   ;;  %s1147_s15 = sphi %s1201_s15, %s1583_s15  }
   0xd   : > { %1555 = sst [smem:[#allocation22_spill]] %s1163_s19  ;;  %s836_s22 = sadd.s32 4294967294, %s1167_s20  }
   0xe   : > { %1556 = sst [smem:[#allocation23_spill]] %s1167_s20  ;;  %s38_s23 = sadd.s32 1, %s1163_s19 }
   0xf   : > { %s47_s24 = sadd.s32 1, %s1155_s17  ;;  %p40_p0 = scmp.ge.s32.totalorder %s38_s23, 2 }
  0x10   : > { %p54_p1 = scmp.ne.s32.totalorder %s1155_s17, %s1151_s16  ;;  %p55_p2 = scmp.eq.s32.totalorder %s1167_s20, 0 }
  0x11   : > { %p60_p3 = scmp.ne.s32.totalorder %s1151_s16, %s1147_s15  ;;  %s1586_s23 = smov (%p40_p0, %s38_s23), 0 }
  0x12   : > { %1557 = sst [smem:[#allocation24_spill]] %s1586_s23  ;;  %p1244_p4 = por %p55_p2, %p54_p1 }
  0x13   : > { %p61_p5 = scmp.eq.s32.totalorder %s1232_s21, 0  ;;  %s42_s26 = ssub.s32 %s1163_s19, %s1586_s23 }
  0x14   : > { %p176_p6 = scmp.eq.s32.totalorder %s1232_s21, 1  ;;  %p45_p7 = scmp.eq.s32.totalorder %s42_s26, 0 }
  0x15   : > { %p1252_p8 = por %p61_p5, %p60_p3  ;;  %p182_p10 = scmp.eq.s32.totalorder %s836_s22, 1 }
  0x16   : > { %p1256_p9 = por %p176_p6, %p54_p1  ;;  %p896_p13 = scmp.lt.s32.totalorder %s1167_s20, 2 }
  0x17   : > { %s1559_s27 = scalar_select %p1252_p8, 1, 0 }
  0x18   : > { %s1560_s28 = scalar_select %p1256_p9, 1, 0 }
  0x19   : > { %s1261_s29 = scalar_select %p45_p7, %s1155_s17, %s47_s24  }
  0x1a   : > { %p1263_p11 = por %p182_p10, %p60_p3  ;;  %s1270_s5 = sand.u32 1, %s1155_s17  }
  0x1b   : > { %1561 = sst [smem:[#allocation25_spill]] %s1261_s29  ;;  %s1273_s6 = sshll.u32 %s1270_s5, 3 }
  0x1c   : > { %s1562_s30 = scalar_select %p1263_p11, 1, 0 }
  0x1d   : > { %s1276_s7 = sshll.u32 %s1163_s19, 7  ;;  %p1280_p0 = pnand %p896_p13, %p1244_p4 }
  0x1e   : > { %s223_s9 = sand.u32 1, %s1167_s20   ;;  %s1564_s1 = sld [smem:[#allocation26_spill]] }
  0x1f   : > { %s1563_s8 = scalar_select %p1280_p0, 1, 0 }
  0x20   : > { %s227_s13 = scalar_lea.vmem [#allocation11], %s1273_s6  ;;  %s1296_s22 = scalar_lea.sflag [#allocation12], %s223_s9 }
  0x21   : > { %s237_s14 = sshll.u32 %s227_s13, 4  ;;  %p1302_p4 = pneg %p1280_p0  ;;  %s1293_s14 = int_to_ptr.vmem [resolvable:$true] %s237_s14 }
  0x24   : > { %s1289_s12 = scalar_lea.hbm %s1564_s1, %s1276_s7  ;;  %s962_s11 = scalar_lea.hbm %s1564_s1, 256 }
  0x25   : > { %s957_s24 = scalar_lea.hbm %s1289_s12, 128  ;;  %p963_p7 = scmp.lt.u32.totalorder %s1289_s12, %s1564_s1 }
  0x26   : > { %p958_p3 = scmp.ne.s32.totalorder %s1289_s12, %s957_s24  ;;  %p964_p10 = scmp.lt.u32.totalorder %s962_s11, %s957_s24 }
  0x27   : > { %p966_p12 = scmp.lt.u32.totalorder %s957_s24, %s1289_s12 }
  0x28   : > { %p960_p5 = pnand %p1302_p4, %p958_p3  ;;  %p965_p13 = por %p964_p10, %p963_p7 }
  0x2a   : > { %p961_p6 = pneg %p960_p5  ;;  %p967_p1 = por %p966_p12, %p965_p13 }
  0x2c   : > { %p968_p2 = pnand %p967_p1, %p961_p6 }
  0x2e   : > { %971 = shalt.err (!%p968_p2)
}
  0x2f   : > { %s972_s9 = scalar_lea.vmem %s1293_s14, 128  ;;  %s1169_s26 = smov [#allocation11]  }
  0x30   : > { %p973_p3 = scmp.ne.s32.totalorder %s1293_s14, %s972_s9  ;;  %s977_s10 = sshll.u32 %s1169_s26, 4  ;;  %s978_s10 = int_to_ptr.vmem [resolvable:$false] %s977_s10 }
  0x31   : > { %s979_s23 = scalar_lea.vmem %s978_s10, 256  ;;  %p980_p9 = scmp.lt.s32.totalorder %s1293_s14, %s978_s10 }
  0x32   : > { %p975_p5 = pnand %p973_p3, %p1302_p4  ;;  %p981_p8 = scmp.lt.s32.totalorder %s979_s23, %s972_s9 }
  0x34   : > { %p976_p11 = pneg %p975_p5  ;;  %p982_p7 = por %p981_p8, %p980_p9 }
  0x36   : > { %p983_p10 = pnand %p982_p7, %p976_p11 }
  0x38   : > { %986 = shalt.err (!%p983_p10)
}
  0x39   : > { %885 = dma.hbm_to_vmem [thread:$0]  (!%p1280_p0), %s1289_s12, 128, %s1293_s14, %s1296_s22  }
  0x3a   : > { %p1566_p12 = scmp.lt.s32.totalorder %s1167_s20, 3  ;;  %p1567_p1 = scmp.ge.s32.totalorder %s1167_s20, 1 }
  0x3b   : > { %s1338_s9 = scalar_lea.hbm %s1539_s0, %s1276_s7  ;;  %s206_s26 = scalar_lea.vmem [#allocation8], %s1273_s6 }
  0x3c   : > { %p1330_p2 = pnand %p1567_p1, %p1566_p12  ;;  %s216_s10 = sshll.u32 %s206_s26, 4  ;;  %s1341_s10 = int_to_ptr.vmem [resolvable:$true] %s216_s10 }
  0x3d   : > { %s1347_s23 = scalar_lea.hbm %s1541_s2, %s1276_s7  ;;  %s203_s1 = scalar_lea.sflag [#allocation9], %s1270_s5 }
  0x3e   : > { %s1568_s24 = scalar_select %p1330_p2, 1, 0 }
  0x3f   : > { %s987_s19 = scalar_lea.hbm %s1338_s9, 128  ;;  %s992_s29 = scalar_lea.hbm %s1539_s0, 256 }
  0x40   : > { %p988_p8 = scmp.ne.s32.totalorder %s1338_s9, %s987_s19  ;;  %p993_p6 = scmp.lt.u32.totalorder %s1338_s9, %s1539_s0 }
  0x41   : > { %p994_p13 = scmp.lt.u32.totalorder %s992_s29, %s987_s19  ;;  %p996_p5 = scmp.lt.u32.totalorder %s987_s19, %s1338_s9 }
  0x42   : > { %p990_p9 = pnand %p988_p8, %p1302_p4 }
  0x43   : > { %p995_p3 = por %p994_p13, %p993_p6 }
  0x44   : > { %p991_p11 = pneg %p990_p9 }
  0x45   : > { %p997_p7 = por %p996_p5, %p995_p3 }
  0x47   : > { %p998_p10 = pnand %p997_p7, %p991_p11 }
  0x49   : > { %1001 = shalt.err (!%p998_p10)
}
  0x4a   : > { %s1002_s26 = scalar_lea.vmem %s1341_s10, 128  ;;  %s1170_s12 = smov [#allocation8]  }
  0x4b   : > { %p1003_p12 = scmp.ne.s32.totalorder %s1341_s10, %s1002_s26  ;;  %s1007_s14 = sshll.u32 %s1170_s12, 4  ;;  %s1008_s14 = int_to_ptr.vmem [resolvable:$false] %s1007_s14 }
  0x4c   : > { %s1009_s17 = scalar_lea.vmem %s1008_s14, 256  ;;  %p1010_p9 = scmp.lt.s32.totalorder %s1341_s10, %s1008_s14 }
  0x4d   : > { %p1005_p1 = pnand %p1003_p12, %p1302_p4  ;;  %p1011_p2 = scmp.lt.s32.totalorder %s1009_s17, %s1002_s26 }
  0x4f   : > { %p1006_p8 = pneg %p1005_p1  ;;  %p1012_p6 = por %p1011_p2, %p1010_p9 }
  0x51   : > { %p1013_p13 = pnand %p1012_p6, %p1006_p8 }
  0x53   : > { %1016 = shalt.err (!%p1013_p13)
}
  0x54   : > { %882 = dma.hbm_to_vmem [thread:$0]  (!%p1280_p0), %s1338_s9, 128, %s1341_s10, %s203_s1  }
  0x55   : > { %s248_s19 = scalar_lea.vmem [#allocation13], %s1273_s6  ;;  %s1017_s29 = scalar_lea.hbm %s1347_s23, 128 }
  0x56   : > { %s258_s20 = sshll.u32 %s248_s19, 4  ;;  %p1018_p11 = scmp.ne.s32.totalorder %s1347_s23, %s1017_s29  ;;  %s259_s20 = int_to_ptr.vmem [resolvable:$true] %s258_s20 }
  0x57   : > { %s1022_s26 = scalar_lea.hbm %s1541_s2, 256  ;;  %p1023_p5 = scmp.lt.u32.totalorder %s1347_s23, %s1541_s2 }
  0x58   : > { %p1020_p2 = pnand %p1018_p11, %p1302_p4  ;;  %p1024_p7 = scmp.lt.u32.totalorder %s1022_s26, %s1017_s29 }
  0x59   : > { %p1026_p12 = scmp.lt.u32.totalorder %s1017_s29, %s1347_s23 }
  0x5a   : > { %p1021_p3 = pneg %p1020_p2  ;;  %p1025_p10 = por %p1024_p7, %p1023_p5 }
  0x5c   : > { %p1027_p1 = por %p1026_p12, %p1025_p10 }
  0x5e   : > { %p1028_p8 = pnand %p1027_p1, %p1021_p3 }
  0x60   : > { %1031 = shalt.err (!%p1028_p8)
}
  0x61   : > { %s1032_s1 = scalar_lea.vmem %s259_s20, 128  ;;  %s1171_s9 = smov [#allocation13]  }
  0x62   : > { %p1033_p9 = scmp.ne.s32.totalorder %s259_s20, %s1032_s1  ;;  %s1037_s10 = sshll.u32 %s1171_s9, 4  ;;  %s1038_s10 = int_to_ptr.vmem [resolvable:$false] %s1037_s10 }
  0x63   : > { %s1039_s17 = scalar_lea.vmem %s1038_s10, 256  ;;  %p1040_p11 = scmp.lt.s32.totalorder %s259_s20, %s1038_s10 }
  0x64   : > { %p1035_p6 = pnand %p1033_p9, %p1302_p4  ;;  %p1041_p2 = scmp.lt.s32.totalorder %s1039_s17, %s1032_s1 }
  0x66   : > { %p1036_p13 = pneg %p1035_p6  ;;  %p1042_p0 = por %p1041_p2, %p1040_p11 }
  0x68   : > { %p1043_p5 = pnand %p1042_p0, %p1036_p13 }
  0x6a   : > { %1046 = shalt.err (!%p1043_p5)
}
  0x6b   : > { %p1569_p7 = scmp.ne.s32.totalorder %s1563_s8, 0  ;;  %s1394_s11 = scalar_lea.hbm %s1542_s3, %s1276_s7 }
  0x6c   : > { %s269_s13 = scalar_lea.vmem [#allocation14], %s1273_s6  ;;  %s266_s12 = scalar_lea.sflag [#allocation15], %s1270_s5 }
  0x6d   : > { %888 = dma.hbm_to_vmem [thread:$0]  (!%p1569_p7), %s1347_s23, 128, %s259_s20, %s1296_s22  }
  0x6e   : > { %s279_s26 = sshll.u32 %s269_s13, 4  ;;  %s1047_s14 = scalar_lea.hbm %s1394_s11, 128  ;;  %s280_s26 = int_to_ptr.vmem [resolvable:$true] %s279_s26 }
  0x6f   : > { %p1048_p0 = scmp.ne.s32.totalorder %s1394_s11, %s1047_s14  ;;  %s1052_s23 = scalar_lea.hbm %s1542_s3, 256 }
  0x70   : > { %p1053_p12 = scmp.lt.u32.totalorder %s1394_s11, %s1542_s3  ;;  %p1054_p1 = scmp.lt.u32.totalorder %s1052_s23, %s1047_s14 }
  0x71   : > { %p1050_p3 = pnand %p1048_p0, %p1302_p4  ;;  %p1056_p9 = scmp.lt.u32.totalorder %s1047_s14, %s1394_s11 }
  0x72   : > { %p1055_p8 = por %p1054_p1, %p1053_p12 }
  0x73   : > { %p1051_p10 = pneg %p1050_p3 }
  0x74   : > { %p1057_p6 = por %p1056_p9, %p1055_p8 }
  0x76   : > { %p1058_p13 = pnand %p1057_p6, %p1051_p10 }
  0x78   : > { %1061 = shalt.err (!%p1058_p13)
}
  0x79   : > { %s1062_s5 = scalar_lea.vmem %s280_s26, 128  ;;  %s1172_s6 = smov [#allocation14]  }
  0x7a   : > { %p1063_p11 = scmp.ne.s32.totalorder %s280_s26, %s1062_s5  ;;  %s1067_s9 = sshll.u32 %s1172_s6, 4  ;;  %s1068_s9 = int_to_ptr.vmem [resolvable:$false] %s1067_s9 }
  0x7b   : > { %s1069_s10 = scalar_lea.vmem %s1068_s9, 256  ;;  %p1070_p0 = scmp.lt.s32.totalorder %s280_s26, %s1068_s9 }
  0x7c   : > { %p1065_p2 = pnand %p1063_p11, %p1302_p4  ;;  %p1071_p3 = scmp.lt.s32.totalorder %s1069_s10, %s1062_s5 }
  0x7e   : > { %p1066_p5 = pneg %p1065_p2  ;;  %p1072_p7 = por %p1071_p3, %p1070_p0 }
  0x80   : > { %p1073_p1 = pnand %p1072_p7, %p1066_p5 }
  0x82   : > { %1076 = shalt.err (!%p1073_p1)
}
  0x83   : > { %p1570_p12 = scmp.ne.s32.totalorder %s1563_s8, 0  ;;  %p1571_p10 = scmp.ne.s32.totalorder %s1568_s24, 0 }
  0x84   : > { %s1418_s25 = sand.u32 (!%p1571_p10), 1, %s1151_s16   ;;  %p1572_p4 = scmp.ne.s32.totalorder (!%p1571_p10), %s1559_s27, 0 }
  0x85   : > { %891 = dma.hbm_to_vmem [thread:$0]  (!%p1570_p12), %s1394_s11, 128, %s280_s26, %s266_s12  }
  0x86   : > { %288 = sbr.rel (%p1571_p10) target bundleno = 482 (0x1e2), region = 36  ;;  %s1421_s17 = sshll.u32 (!%p1571_p10), %s1418_s25, 3 }
  0x87   : > { %s291_s19 = scalar_lea.sflag (!%p1571_p10), [#allocation9], %s1418_s25  ;;  %s294_s29 = scalar_lea.vmem (!%p1571_p10), [#allocation8], %s1421_s17 }
  0x8d   : > { %1130 = dma.done.wait (%p1572_p4), %s291_s19, 128  }
  0x8e   : > { %1132 = vsyncadd (%p1572_p4), %s291_s19, 4294967168  ;;  %s299_s8 = sand.u32 1, %s1232_s21   ;;  %s303_s11 = scalar_lea.vmem [#allocation11], %s1421_s17 }
  0x8f   : > { %s300_s24 = scalar_lea.sflag [#allocation12], %s299_s8 }
  0x90   : > { %1134 = dma.done.wait (%p1572_p4), %s300_s24, 256  }
  0x91   : > { %1136 = vsyncadd (%p1572_p4), %s300_s24, 4294967040  ;;  %s312_s13 = scalar_lea.vmem [#allocation13], %s1421_s17  ;;  %s318_s26 = scalar_lea.sflag [#allocation15], %s1418_s25 }
  0x92   : > { %s321_s12 = scalar_lea.vmem [#allocation14], %s1421_s17 }
  0x93   : > { %1138 = dma.done.wait (%p1572_p4), %s318_s26, 128  }
  0x94   : > { %1140 = vsyncadd (%p1572_p4), %s318_s26, 4294967168  ;;  %v371_v0 = vlaneseq  ;;  %vm378_vm0 = vcmask 523264   ;;  %vm381_vm1 = vcmask 516096   ;;  %v1173_v2 = vmov 0.0   ;;  %v383_v3 = vld [vmem:[%s294_s29] sm:$0xff]  ;;  %v384_v4 = vld [vmem:[%s303_s11] sm:$0xff] }
  0x95   : > { %379 = vst.msk [vmem:[#allocation5] sm:$0xff] %vm378_vm0, %v1173_v2  ;;  %380 = vst.msk [vmem:[#allocation6] sm:$0xff] %vm378_vm0, %v1173_v2  ;;  %vm388_vm3 = vcmask 1043456   ;;  %v497_v5 = vld [vmem:[%s312_s13] sm:$0xff]  ;;  %v386_v6 = vcombine.high %v383_v3, %v383_v3  ;;  %v453_v8 = vsub.f32 %v384_v4, %v383_v3  ;;  %v498_v10 = vld [vmem:[%s321_s12] sm:$0xff]  ;;  %vm537_vm4 = vcmask 1040384  }
  0x96   : > { %vm1442_vm2 = vcmp.lt.s32.totalorder %v371_v0, 256  ;;  %382 = vst.msk [vmem:[#allocation7] sm:$0x1] %vm381_vm1, %v1173_v2  ;;  %v389_v7 = vsel %vm388_vm3, %v383_v3, 0.0  ;;  %v504_v9 = vmul.f32 %v497_v5, %v497_v5  ;;  %949 = vlog2.f32 %v498_v10  ;;  %s856_s23 = sshll.u32 %s1159_s18, 7  ;;  %s360_s10 = scalar_lea.vmem [#allocation16], %s1421_s17 }
  0x97   : > { %375 = vst.msk [vmem:[#allocation2] sm:$0x3] %vm1442_vm2, %v1173_v2  ;;  %376 = vst.msk [vmem:[#allocation3] sm:$0x3] %vm1442_vm2, %v1173_v2  ;;  %v390_v11 = vrot.slane %v389_v7, 4  ;;  %v396_v14 = vsel %vm388_vm3, %v386_v6, 0.0  ;;  %v455_v15 = vmul.f32 %v453_v8, %v453_v8  ;;  %s1490_s18 = scalar_lea.hbm %s1543_s4, %s856_s23 }
  0x98   : > { %377 = vst.msk [vmem:[#allocation4] sm:$0x3] %vm1442_vm2, %v1173_v2  ;;  %v397_v19 = vrot.slane %v396_v14, 4  ;;  %v1174_v25 = vmov 1966171168   ;;  %v1461_v37 = vshrl.u32 %v371_v0, 7 }
  0x99   : > { %v391_v18 = vadd.f32 %v390_v11, %v389_v7  ;;  %v457_v20 = vcombine.high %v455_v15, %v455_v15  ;;  %v459_v21 = vsel %vm388_vm3, %v455_v15, 0.0  ;;  %v410_v26 = vunpack.c.l.s4 %v1174_v25  ;;  %s683_s19 = sshll.u32 %s360_s10, 4  ;;  %s670_s17 = scalar_lea.sflag [#allocation10], %s1418_s25  ;;  %s1492_s19 = int_to_ptr.vmem [resolvable:$true] %s683_s19 }
  0x9a   : > { %v398_v23 = vadd.f32 %v397_v19, %v396_v14  ;;  %v460_v24 = vrot.slane %v459_v21, 4  ;;  %vm663_vm5 = vcmp.eq.s32.totalorder %v1461_v37, 1  ;;  %vm662_vm6 = vcmp.eq.s32.totalorder %v1461_v37, 0  ;;  %s1077_s11 = scalar_lea.vmem %s1492_s19, 128  ;;  %p1575_p8 = scmp.ne.s32.totalorder %s1560_s28, 0 }
  0x9b   : > { %v392_v22 = vrot.slane %v391_v18, 2  ;;  %v466_v27 = vsel %vm388_vm3, %v457_v20, 0.0  ;;  %v411_v36 = vunpack.c.0.s8 %v410_v26  ;;  %v529_v20 = vsub.s32 0, %v1461_v37  ;;  %p1078_p7 = scmp.ne.s32.totalorder %s1492_s19, %s1077_s11  ;;  %s1175_s13 = smov [#allocation16]  }
  0x9c   : > { %v499_v12 = vld [vmem:[#allocation5] sm:$0xff]  ;;  %v503_v13 = vld [vmem:[#allocation6] sm:$0xff]  ;;  %v399_v29 = vrot.slane %v398_v23, 2  ;;  %v461_v30 = vadd.f32 %v460_v24, %v459_v21  ;;  %v467_v31 = vrot.slane %v466_v27, 4  ;;  %v533_v21 = vsub.s32 1, %v1461_v37  ;;  %s1081_s26 = sshll.u32 %s1175_s13, 4  ;;  %s1082_s26 = int_to_ptr.vmem [resolvable:$false] %s1081_s26 }
  0x9d   : > { %v500_v16 = vadd.f32 %v499_v12, %v497_v5  ;;  %v505_v17 = vadd.f32 %v504_v9, %v503_v13  ;;  %v393_v28 = vadd.f32 %v392_v22, %v391_v18  ;;  %v414_v51 = vsub.s32 %v411_v36, %v1461_v37  ;;  %v507_v18 = vld [vmem:[#allocation7] sm:$0x1]  ;;  %p1079_p9 = pnand %p1078_p7, %p1575_p8  ;;  %s1083_s12 = scalar_lea.vmem %s1082_s26, 256 }
  0x9e   : > { %v400_v33 = vadd.f32 %v399_v29, %v398_v23  ;;  %v462_v34 = vrot.slane %v461_v30, 2  ;;  %v468_v35 = vadd.f32 %v467_v31, %v466_v27  ;;  %v405_v4 = vld [vmem:[#allocation2] sm:$0x3]  ;;  %v430_v9 = vld [vmem:[#allocation3] sm:$0x3]  ;;  %p1084_p13 = scmp.lt.s32.totalorder %s1492_s19, %s1082_s26  ;;  %p1085_p11 = scmp.lt.s32.totalorder %s1083_s12, %s1077_s11 }
  0x9f   : > { %502 = vst.msk [vmem:[#allocation5] sm:$0xff] %vm378_vm0, %v500_v16  ;;  %506 = vst.msk [vmem:[#allocation6] sm:$0xff] %vm378_vm0, %v505_v17  ;;  %v394_v32 = vrot.slane %v393_v28, 1  ;;  %v454_v10 = vld [vmem:[#allocation4] sm:$0x3]  ;;  %p1080_p6 = pneg %p1079_p9 }
  0xa0   : > { %v950_v38 = vpop.eup %949  ;;  %v401_v40 = vrot.slane %v400_v33, 1  ;;  %v463_v41 = vadd.f32 %v462_v34, %v461_v30  ;;  %v469_v42 = vrot.slane %v468_v35, 2  ;;  %p1086_p2 = por %p1085_p11, %p1084_p13 }
  0xa1   : > { %v395_v39 = vadd.f32 %v394_v32, %v393_v28  ;;  %v509_v46 = vmul.f32 0.6931472, %v950_v38 }
  0xa2   : > { %v402_v47 = vadd.f32 %v401_v40, %v400_v33  ;;  %v464_v49 = vrot.slane %v463_v41, 1  ;;  %v470_v50 = vadd.f32 %v469_v42, %v468_v35  ;;  %p1087_p5 = pnand %p1086_p2, %p1080_p6 }
  0xa3   : > { %v403_v48 = vmul.f32 0.25, %v395_v39  ;;  %v511_v53 = vmul.f32 1.442695, %v509_v46 }
  0xa4   : > { %v404_v54 = vmul.f32 0.25, %v402_v47  ;;  %v465_v56 = vadd.f32 %v464_v49, %v463_v41  ;;  %v471_v57 = vrot.slane %v470_v50, 1 }
  0xa5   : > { %v431_v55 = vmul.f32 %v403_v48, %v403_v48  ;;  %v512_v58 = vsel %vm378_vm0, %v511_v53, 0.0 }
  0xa6   : > { %v566_v43 = vld [vmem:[#allocation5] sm:$0xff]  ;;  %v571_v44 = vld [vmem:[#allocation6] sm:$0xff]  ;;  %v408_v59 = vcombine.low %v403_v48, %v404_v54  ;;  %v432_v60 = vmul.f32 %v404_v54, %v404_v54  ;;  %v472_v61 = vadd.f32 %v471_v57, %v470_v50  ;;  %v513_v62 = vrot.slane %v512_v58, 4 }
  0xa7   : > { %v568_v45 = vsel %vm378_vm0, %v566_v43, 0.0  ;;  %v572_v52 = vsel %vm378_vm0, %v571_v44, 0.0 }
  0xa8   : > { %569 = vadd.xlane.f32.xlu1 %v568_v45  ;;  %v415_v63 = vrot.slane %v408_v59, %v414_v51  ;;  %v435_v0 = vcombine.low %v431_v55, %v432_v60  ;;  %v475_v2 = vcombine.low %v465_v56, %v472_v61  ;;  %v514_v3 = vadd.f32 %v513_v62, %v512_v58 }
  0xaa   : > { %v422_v5 = vrot.slane %v415_v63, %v414_v51  ;;  %v442_v6 = vrot.slane %v435_v0, %v414_v51  ;;  %v482_v7 = vrot.slane %v475_v2, %v414_v51  ;;  %v515_v8 = vrot.slane %v514_v3, 2 }
  0xac   : > { %573 = vadd.xlane.f32.xlu1 %v572_v52  ;;  %v424_v11 = vadd.f32 %v422_v5, %v405_v4  ;;  %v449_v12 = vrot.slane %v442_v6, %v414_v51  ;;  %v489_v13 = vrot.slane %v482_v7, %v414_v51  ;;  %v516_v14 = vadd.f32 %v515_v8, %v514_v3 }
  0xae   : > { %429 = vst.msk [vmem:[#allocation2] sm:$0x3] %vm1442_vm2, %v424_v11  ;;  %v451_v15 = vadd.f32 %v449_v12, %v430_v9  ;;  %v491_v16 = vadd.f32 %v489_v13, %v454_v10  ;;  %v517_v17 = vrot.slane %v516_v14, 1 }
  0xb0   : > { %452 = vst.msk [vmem:[#allocation3] sm:$0x3] %vm1442_vm2, %v451_v15  ;;  %492 = vst.msk [vmem:[#allocation4] sm:$0x3] %vm1442_vm2, %v491_v16  ;;  %v518_v19 = vadd.f32 %v517_v17, %v516_v14 }
  0xb2   : > { %v519_v22 = vadd.f32 %v518_v19, %v507_v18 }
  0xb4   : > { %521 = vst.msk [vmem:[#allocation7] sm:$0x1] %vm381_vm1, %v519_v22 }
  0xb5   : > { %v525_v23 = vld [vmem:[#allocation2] sm:$0x3] }
  0xb6   : > { %v530_v24 = vrot.slane %v525_v23, %v529_v20  ;;  %v534_v25 = vrot.slane %v525_v23, %v533_v21 }
  0xb7   : > { %v543_v26 = vld [vmem:[#allocation3] sm:$0x3]  ;;  %v626_v27 = vld [vmem:[#allocation4] sm:$0x3] }
  0xb8   : > { %v538_v28 = vsel %vm537_vm4, %v530_v24, 0.0  ;;  %v539_v29 = vsel %vm537_vm4, %v534_v25, 0.0  ;;  %v548_v1 = vrot.slane %v543_v26, %v529_v20  ;;  %v552_v30 = vrot.slane %v543_v26, %v533_v21 }
  0xb9   : > { %v540_v31 = vadd.f32 %v539_v29, %v538_v28  ;;  %v631_v32 = vrot.slane %v626_v27, %v529_v20  ;;  %v635_v33 = vrot.slane %v626_v27, %v533_v21 }
  0xba   : > { %v555_v34 = vsel %vm537_vm4, %v548_v1, 0.0  ;;  %v556_v35 = vsel %vm537_vm4, %v552_v30, 0.0 }
  0xbb   : > { %541 = vadd.xlane.f32.xlu0 %v540_v31  ;;  %v557_v36 = vadd.f32 %v556_v35, %v555_v34  ;;  %v638_v38 = vsel %vm537_vm4, %v631_v32, 0.0  ;;  %v639_v39 = vsel %vm537_vm4, %v635_v33, 0.0  ;;  %v613_v41 = vld [vmem:[#allocation7] sm:$0x1] }
  0xbc   : > { %v640_v40 = vadd.f32 %v639_v39, %v638_v38  ;;  %v615_v42 = vsel %vm381_vm1, %v613_v41, 0.0 }
  0xbe   : > { %641 = vadd.xlane.f32.xlu1 %v640_v40 }
  0xbf   : > { %558 = vadd.xlane.f32.xlu0 %v557_v36 }
  0xc3   : > { %616 = vadd.xlane.f32.xlu0 %v615_v42 }
 0x135   : > { %v570_v43 = vpop.xlane.xlu1 %569 }
 0x136   : > { %v575_v52 = vmul.f32 %v570_v43, %v570_v43 }
 0x138   : > { %v576_v59 = vmul.f32 0.015625, %v575_v52 }
 0x139   : > { %v574_v44 = vpop.xlane.xlu1 %573 }
 0x13a   : > { %v577_v2 = vsub.f32 %v574_v44, %v576_v59 }
 0x13c   : > { %v578_v6 = vmax.f32 %v577_v2, 0.0 }
 0x13e   : > { %v579_v9 = vmul.f32 0.015873017, %v578_v6 }
 0x148   : > { %v542_v45 = vpop.xlane.xlu0 %541 }
 0x149   : > { %v560_v46 = vmul.f32 %v542_v45, %v542_v45 }
 0x14b   : > { %v561_v47 = vmul.f32 0.00390625, %v560_v46  ;;  %v642_v48 = vpop.xlane.xlu1 %641 }
 0x14c   : > { %v559_v49 = vpop.xlane.xlu0 %558  ;;  %v643_v50 = vrot.slane %v642_v48, 4 }
 0x14d   : > { %v562_v51 = vsub.f32 %v559_v49, %v561_v47 }
 0x14e   : > { %v644_v53 = vadd.f32 %v643_v50, %v642_v48 }
 0x14f   : > { %v563_v54 = vmax.f32 %v562_v51, 0.0 }
 0x150   : > { %v617_v55 = vpop.xlane.xlu0 %616  ;;  %v645_v56 = vrot.slane %v644_v53, 2 }
 0x151   : > { %v564_v57 = vmul.f32 0.003921569, %v563_v54  ;;  %v618_v58 = vrot.slane %v617_v55, 4 }
 0x152   : > { %v646_v60 = vadd.f32 %v645_v56, %v644_v53 }
 0x153   : > { %v565_v61 = vadd.f32 1e-10, %v564_v57  ;;  %v619_v62 = vadd.f32 %v618_v58, %v617_v55 }
 0x154   : > { %v647_v3 = vrot.slane %v646_v60, 1 }
 0x155   : > { %v583_v63 = vrot.slane %v565_v61, %v529_v20  ;;  %v620_v0 = vrot.slane %v619_v62, 2 }
 0x156   : > { %v648_v7 = vadd.f32 %v647_v3, %v646_v60 }
 0x157   : > { %951 = vrcp.f32 %v583_v63  ;;  %v621_v4 = vadd.f32 %v620_v0, %v619_v62 }
 0x159   : > { %v622_v5 = vrot.slane %v621_v4, 1 }
 0x15b   : > { %v623_v8 = vadd.f32 %v622_v5, %v621_v4 }
 0x15d   : > { %861 = vpush %v623_v8 }
 0x15e   : > { %863 = vpush %v648_v7 }
 0x161   : > { %v952_v10 = vpop.eup %951 }
 0x162   : > { %v585_v11 = vmul.f32 %v952_v10, %v579_v9 }
 0x164   : > { %v586_v12 = vrot.slane %v585_v11, 4 }
 0x166   : > { %v587_v13 = vadd.f32 %v586_v12, %v585_v11 }
 0x168   : > { %v588_v14 = vrot.slane %v587_v13, 2 }
 0x16a   : > { %v589_v15 = vadd.f32 %v588_v14, %v587_v13 }
 0x16c   : > { %v590_v16 = vrot.slane %v589_v15, 1 }
 0x16e   : > { %v591_v17 = vadd.f32 %v590_v16, %v589_v15 }
 0x170   : > { %953 = vrcp.f32 %v591_v17 }
 0x17a   : > { %v954_v18 = vpop.eup %953 }
 0x17b   : > { %v593_v19 = vmul.f32 %v954_v18, %v585_v11 }
 0x17d   : > { %v601_v20 = vadd.f32 1e-10, %v593_v19  ;;  %v594_v21 = vrot.slane %v593_v19, 4  ;;  %v600_v25 = vsub.f32 0.0, %v593_v19 }
 0x17f   : > { %955 = vlog2.f32 %v601_v20  ;;  %v595_v24 = vmax.f32 %v593_v19, %v594_v21 }
 0x181   : > { %v596_v28 = vrot.slane %v595_v24, 2 }
 0x183   : > { %v597_v30 = vmax.f32 %v595_v24, %v596_v28 }
 0x185   : > { %v598_v33 = vrot.slane %v597_v30, 1 }
 0x187   : > { %v599_v36 = vmax.f32 %v597_v30, %v598_v33 }
 0x189   : > { %v956_v22 = vpop.eup %955 }
 0x18a   : > { %v603_v23 = vmul.f32 0.6931472, %v956_v22 }
 0x18c   : > { %v605_v26 = vmul.f32 1.442695, %v603_v23 }
 0x18e   : > { %v606_v27 = vmul.f32 %v605_v26, %v600_v25  ;;  %s862_s21 = spop %861 }
 0x18f   : > { %s625_s27 = ssub.f32 0.0, %s862_s21  ;;  %s864_s14 = spop %863 }
 0x190   : > { %v607_v29 = vrot.slane %v606_v27, 4  ;;  %s650_s1 = smul.f32 4.8828124e-06, %s864_s14 }
 0x191   : > { %s651_s22 = smul.f32 0.0009765625, %s625_s27 }
 0x192   : > { %v608_v1 = vadd.f32 %v607_v29, %v606_v27 }
 0x193   : > { %s652_s20 = sadd.f32 %s651_s22, %s650_s1 }
 0x194   : > { %v609_v31 = vrot.slane %v608_v1, 2 }
 0x196   : > { %v610_v32 = vadd.f32 %v609_v31, %v608_v1 }
 0x198   : > { %v611_v34 = vrot.slane %v610_v32, 1 }
 0x19a   : > { %v612_v35 = vadd.f32 %v611_v34, %v610_v32 }
 0x19c   : > { %865 = vpush %v612_v35 }
 0x19d   : > { %867 = vpush %v599_v36 }
 0x1cd   : > { %s866_s7 = spop %865 }
 0x1ce   : > { %s655_s5 = smul.f32 0.0005, %s866_s7  ;;  %s868_s6 = spop %867 }
 0x1cf   : > { %s659_s9 = smul.f32 0.5, %s868_s6 }
 0x1d0   : > { %s656_s29 = sadd.f32 %s655_s5, %s652_s20 }
 0x1d1   : > { %v664_v38 = vstv %s659_s9 }
 0x1d2   : > { %v666_v39 = vstv %s656_s29  ;;  %v665_v40 = vsel %vm663_vm5, %v664_v38, 0.0 }
 0x1d3   : > { %v667_v41 = vsel %vm662_vm6, %v666_v39, %v665_v40 }
 0x1d4   : > { %668 = vst [vmem:[%s360_s10] sm:$0xff] %v667_v41 }
 0x1d5   : > { %1090 = shalt.err (!%p1087_p5)
}
 0x1d6   : > { %s1091_s25 = scalar_lea.hbm %s1490_s18, 128  ;;  %s1095_s14 = scalar_lea.hbm %s1543_s4, 256 }
 0x1d7   : > { %p1092_p0 = scmp.ne.s32.totalorder %s1490_s18, %s1091_s25  ;;  %p1096_p12 = scmp.lt.u32.totalorder %s1490_s18, %s1543_s4 }
 0x1d8   : > { %p1097_p10 = scmp.lt.u32.totalorder %s1095_s14, %s1091_s25  ;;  %p1099_p7 = scmp.lt.u32.totalorder %s1091_s25, %s1490_s18 }
 0x1d9   : > { %p1093_p3 = pnand %p1092_p0, %p1575_p8 }
 0x1da   : > { %p1098_p4 = por %p1097_p10, %p1096_p12 }
 0x1db   : > { %p1094_p1 = pneg %p1093_p3 }
 0x1dc   : > { %p1100_p9 = por %p1099_p7, %p1098_p4 }
 0x1de   : > { %p1101_p6 = pnand %p1100_p9, %p1094_p1 }
 0x1e0   : > { %1104 = shalt.err (!%p1101_p6)
}
 0x1e1   : > { %877 = dma.vmem_to_hbm [thread:$0]  (%p1575_p8), %s1492_s19, 128, %s1490_s18, %s670_s17  }
 0x1e2 PF: > { %s1576_s23 = sld [smem:[#allocation23_spill]]  ;;  %s695_s20 = sand.u32 1, %s1147_s15  }
 0x1e3   : > { %p1577_p13 = scmp.ne.s32.totalorder %s1562_s30, 0  ;;  %s696_s7 = scalar_lea.sflag [#allocation10], %s695_s20 }
 0x1e8   : > { %p1578_p11 = scmp.ge.s32.totalorder %s1576_s23, 2 }
 0x1ea   : > { %p893_p2 = pnand %p1578_p11, %p1577_p13 }
 0x1ec   : > { %1142 = dma.done.wait (!%p893_p2), %s696_s7, 128  }
 0x1ed   : > { %1144 = vsyncadd (!%p893_p2), %s696_s7, 4294967168  ;;  %s26_s20 = sadd.s32 1, %s1576_s23   ;;  %s1579_s5 = sld [smem:[#allocation21_spill]] }
 0x1ee   : > { %p23_p5 = scmp.ge.s32.totalorder %s26_s20, 4   ;;  %s1580_s17 = sld [smem:[#allocation25_spill]] }
 0x1ef   : > { %s1581_s18 = sld [smem:[#allocation22_spill]]  ;;  %s1582_s19 = sld [smem:[#allocation24_spill]] }
 0x1f0   : > { %s1583_s15 = smov %s1151_s16  ;;  %25 = sbr.rel (!%p23_p5) target bundleno = 12 (0xc), region = 130 }
 0x1f3   : > { %s1584_s16 = smov %s1579_s5 }
 0x1f7   :  { %701 = vsyncpa [#allocation9], 1 }
 0x1f8   :  { %703 = vsyncpa [#allocation9 + $0x1], 1 }
 0x1f9   :  { %704 = vsyncpa [#allocation12], 1 }
 0x1fa   :  { %706 = vsyncpa [#allocation12 + $0x1], 1 }
 0x1fb   :  { %707 = vsyncpa [#allocation15], 1 }
 0x1fc   :  { %709 = vsyncpa [#allocation15 + $0x1], 1 }
 0x1fd   :  { %710 = vsyncpa [#allocation10], 1 }
 0x1fe   :  { %712 = vsyncpa [#allocation10 + $0x1], 1 }

</bundles_post_ra>
